<compile_context>
chip_gen: v7x
topology: tpu7x:2x2x1
jax: 0.10.0
libtpu: 0.0.40
codegen_flags: <defaults>
</compile_context>

<pallas_src>
import functools

import jax
import jax.numpy as jnp
from jax import lax
from jax.experimental import pallas as pl
from jax.experimental.pallas import tpu as pltpu


def _squash(interest, block_ones):
    """MIND squash.  Per-interest squared norm via block-diag-ones MXU matmul
    (already broadcast over each interest's D lanes); exact divide + rsqrt on the
    tiny (BT, K*D) array."""
    cap_norm = jnp.dot(interest * interest, block_ones,
                       preferred_element_type=jnp.float32)          # (BT, KD)
    scalar = cap_norm / (1.0 + cap_norm) * lax.rsqrt(cap_norm + 1e-9)
    return scalar * interest


def _capsule_kernel(item_ref, mask_ref, w_ref, ones_ref, out_ref, *,
                    interest_num, hidden_size, routing_times, mask_seq_major):
    """One batch tile of MIND dynamic routing.

    item_ref: (S, BT, D)   seq-major item embeddings (bf16 or f32)
    mask_ref: (S, BT) or (BT, S)  0/1 float mask
    w_ref:    (S, D, K*D)  shared bilinear weight, pre-permuted (bf16 or f32)
    ones_ref: (K*D, K*D)   block-diagonal ones (f32), precomputed in the wrapper
    out_ref:  (BT, K*D)    lane-dense interest capsules (f32)
    """
    K, D = interest_num, hidden_size
    KD = K * D
    S, BT = item_ref.shape[0], item_ref.shape[1]

    # ---- Bilinear map on the MXU (batched over s), f32 accumulate:
    # hat[s,b,n] = sum_d u[s,b,d] * w[s,d,n]
    hat = jnp.einsum("sbd,sdn->sbn", item_ref[...], w_ref[...],
                     preferred_element_type=jnp.float32)             # (S, BT, KD) f32

    if mask_seq_major:
        mask_t = mask_ref[...]                                        # (S, BT)
    else:
        mask_t = jnp.transpose(mask_ref[...])                         # (BT, S) -> (S, BT)
    mask_b = mask_t[:, :, None].astype(jnp.float32)                   # (S, BT, 1) lane-broadcast

    block_ones = ones_ref[...]                                        # (KD, KD) f32

    # ---- Routing iteration 0: logits are all zero -> softmax is exactly 1/S
    # everywhere; mask-after-softmax means interest0 = (1/S) * sum_s mask * hat.
    inv_s = jnp.float32(1.0 / S)
    interest = inv_s * jnp.sum(mask_b * hat, axis=0)                  # (BT, KD)
    interest = _squash(interest, block_ones)

    cwx = None                                                        # routing logits, replicated over D lanes
    for i in range(1, routing_times):
        if (i - 1) < 2:   # PyTorch reference only adds delta while i < 2
            # delta[s,b,k (all j)] = sum_j hat[s,b,k*D+j] * interest[b,k*D+j]
            # TODO(synk): at production S*BT*KD, chunk this over S (fori_loop, unroll=True)
            # or cast prod to bf16 to bound the largest transient and speed the heaviest MXU op.
            prod = (hat * interest[None, :, :]).reshape(S * BT, KD)
            deltax = jnp.dot(prod, block_ones,
                             preferred_element_type=jnp.float32).reshape(S, BT, KD)
            cwx = deltax if cwx is None else cwx + deltax

        # masked softmax over the sequence axis fused with the interest reduction.
        # Padded positions stay in the denominator (reference semantics: mask AFTER softmax).
        mx = jnp.max(cwx, axis=0)                                     # (BT, KD)
        e = jnp.exp(cwx - mx[None, :, :])                             # (S, BT, KD)
        denom = jnp.sum(e, axis=0)                                    # (BT, KD)
        num = jnp.sum((mask_b * e) * hat, axis=0)                     # (BT, KD)
        interest = num * pl.reciprocal(denom, approx=True)
        interest = _squash(interest, block_ones)

    out_ref[...] = interest.astype(out_ref.dtype)                     # lane-dense (BT, KD) store


def _pick_block_b(B):
    # Prefer >= 2 grid steps (so dimension_semantics=("parallel",) can shard batch tiles
    # across both v7x TensorCores) with a batch tile that is a multiple of 8 and at most
    # 128 (fills the 128-row MXU on v5e/v7x).  Pass block_b=256 explicitly on v6e to feed
    # its 256-wide MXU when batch and VMEM allow.
    for bt in (128, 64, 32, 16, 8):
        if B % bt == 0 and B // bt >= 2:
            return bt
    return B


def _const_block_spec(block_shape, index_map):
    # Constant-per-grid-step inputs: single-buffer them (their index_map never changes,
    # so double buffering would only double their VMEM footprint without saving any DMA).
    try:
        return pl.BlockSpec(block_shape, index_map, pipeline_mode=pl.Buffered(1))
    except TypeError:  # older BlockSpec signature without pipeline_mode
        return pl.BlockSpec(block_shape, index_map)


def capsule_network_forward(item_eb, mask, w, *, interest_num, routing_times=3,
                            block_b=None, matmul_dtype=jnp.bfloat16):
    """item_eb: (B,S,D), mask: (B,S), w: (1,S,K*D,D) -> (B,K,D) f32.

    matmul_dtype controls only the MXU operand precision of the bilinear map
    (accumulation and all routing element-wise math stay f32)."""
    B, S, D = item_eb.shape
    K = interest_num
    KD = K * D

    BT = block_b if block_b is not None else _pick_block_b(B)
    assert B % BT == 0, "batch must be divisible by the batch tile"
    assert BT == B or BT % 8 == 0, "batch tile must be a multiple of 8 (or the full batch)"

    # Plain-JAX glue (layout only, no compute moved out of the kernel):
    #  - item_eb -> seq-major (S, B, D) so the bilinear is a clean s-batched matmul
    #  - w (1, S, K*D, D) -> (S, D, K*D) so hat comes out of the MXU lane-dense over K*D
    #  - matmul operands cast to bf16 (f32 accumulate in-kernel)
    item_t = jnp.transpose(item_eb, (1, 0, 2)).astype(matmul_dtype)
    w_t = jnp.transpose(w[0], (0, 2, 1)).astype(matmul_dtype)
    mask_f = mask.astype(jnp.float32)

    # mask seq-major when the tile layout allows (avoids an in-kernel XLU transpose);
    # otherwise keep it batch-major and transpose the small tile in-kernel.
    if BT == B or BT % 128 == 0:
        mask_in = jnp.transpose(mask_f)                               # (S, B)
        mask_spec = pl.BlockSpec((S, BT), lambda b: (0, b))
        mask_seq_major = True
    else:
        mask_in = mask_f                                              # (B, S)
        mask_spec = pl.BlockSpec((BT, S), lambda b: (b, 0))
        mask_seq_major = False

    # block-diagonal ones, built once per call (not per grid step).
    lane = jnp.arange(KD, dtype=jnp.int32)
    block_ones = (lane[:, None] // D == lane[None, :] // D).astype(jnp.float32)

    kernel = functools.partial(_capsule_kernel, interest_num=K, hidden_size=D,
                               routing_times=routing_times, mask_seq_major=mask_seq_major)

    n_delta = min(2, routing_times - 1) if routing_times > 1 else 0
    itm = jnp.dtype(matmul_dtype).itemsize
    flops = (2 * B * S * D * KD
             + routing_times * 2 * B * KD * KD
             + n_delta * 2 * B * S * KD * KD
             + routing_times * 4 * B * S * KD)
    transcendentals = (routing_times - 1) * B * S * KD + routing_times * 2 * B * KD
    bytes_accessed = (B * S * D * itm + S * D * KD * itm
                      + B * S * 4 + KD * KD * 4 + B * KD * 4)

    # VMEM budget: single-buffered weight + block-ones, double-buffered item/mask/out tiles,
    # ~4 live (S,BT,KD) f32 intermediates (hat, cwx, e, prod/deltax) + 2x headroom, capped by
    # the device's physical VMEM (generation-aware; ~64 MiB on v7x, 128 MiB on v5e/v6e).
    vmem_est = (S * D * KD * itm + KD * KD * 4
                + 2 * S * BT * D * itm + 2 * S * BT * 4 + 2 * BT * KD * 4
                + 4 * S * BT * KD * 4)
    try:
        vmem_cap = int(pltpu.get_tpu_info().vmem_capacity_bytes)
    except Exception:
        vmem_cap = 64 * 1024 * 1024
    vmem_limit = int(min(max(2 * vmem_est, 32 * 1024 * 1024), int(0.75 * vmem_cap)))

    out_flat = pl.pallas_call(
        kernel,
        out_shape=jax.ShapeDtypeStruct((B, KD), jnp.float32),
        grid_spec=pltpu.PrefetchScalarGridSpec(
            num_scalar_prefetch=0,
            grid=(B // BT,),
            in_specs=[
                pl.BlockSpec((S, BT, D), lambda b: (0, b, 0)),        # item (seq-major)
                mask_spec,                                            # mask
                _const_block_spec((S, D, KD), lambda b: (0, 0, 0)),   # shared bilinear weight
                _const_block_spec((KD, KD), lambda b: (0, 0)),        # block-diagonal ones
            ],
            out_specs=pl.BlockSpec((BT, KD), lambda b: (b, 0)),       # lane-dense K*D store
        ),
        compiler_params=pltpu.CompilerParams(
            dimension_semantics=("parallel",),
            vmem_limit_bytes=vmem_limit,
        ),
        cost_estimate=pl.CostEstimate(
            flops=flops,
            transcendentals=transcendentals,
            bytes_accessed=bytes_accessed),
    )(item_t, mask_in, w_t, block_ones)

    return out_flat.reshape(B, K, D)


def _reference_forward(item_eb, mask, w, *, interest_num, routing_times=3):
    """Pure-JAX reference mirroring the PyTorch forward (bilinear_type=2, relu_layer=False)."""
    B, S, D = item_eb.shape
    K = interest_num
    u = item_eb[:, :, None, :]                                        # (B, S, 1, D)
    hat = jnp.sum(w[:, :S, :, :] * u, axis=3)                         # (B, S, K*D)
    hat = hat.reshape(B, S, K, D).transpose(0, 2, 1, 3)               # (B, K, S, D)
    cw = jnp.zeros((B, K, S), jnp.float32)
    atten = jnp.broadcast_to(mask[:, None, :], (B, K, S))
    interest = None
    for i in range(routing_times):
        sw = jax.nn.softmax(cw, axis=-1)
        sw = jnp.where(atten == 0, jnp.zeros_like(sw), sw)[:, :, None, :]   # (B, K, 1, S)
        interest = jnp.matmul(sw, hat)                                # (B, K, 1, D)
        cap_norm = jnp.sum(interest * interest, axis=-1, keepdims=True)
        scalar = cap_norm / (1 + cap_norm) / jnp.sqrt(cap_norm + 1e-9)
        interest = scalar * interest
        if i < 2:                                                     # PyTorch: delta only while i < 2
            delta = jnp.matmul(hat, jnp.swapaxes(interest, 2, 3)).reshape(B, K, S)
            cw = cw + delta
    return interest.reshape(B, K, D)


if __name__ == "__main__":
    # Small shapes consistent with the module: batch=8, seq_len=8, hidden=32, interest_num=4
    # (K*D = 128 -> one full lane tile for the bilinear / output stores).
    B, S, D, K = 8, 8, 32, 4
    key = jax.random.PRNGKey(0)
    k1, k2, k3 = jax.random.split(key, 3)

    item_eb = jax.random.normal(k1, (B, S, D), dtype=jnp.float32)
    # binary mask with a few padded positions; keep at least one valid position per row
    mask = (jax.random.uniform(k2, (B, S)) < 0.75).astype(jnp.float32)
    mask = mask.at[:, 0].set(1.0)
    # Deterministic init of the bilinear routing weight (module only declares its shape).
    w = 0.1 * jax.random.normal(k3, (1, S, K * D, D), dtype=jnp.float32)

    ref = _reference_forward(item_eb, mask, w, interest_num=K, routing_times=3)

    # Exact-semantics variant (f32 matmul operands): tight check of the routing logic.
    out_f32 = capsule_network_forward(item_eb, mask, w, interest_num=K, routing_times=3,
                                      matmul_dtype=jnp.float32)
    out_f32 = jax.block_until_ready(out_f32)
    assert out_f32.shape == (B, K, D)
    assert jnp.allclose(out_f32, ref, atol=2e-3, rtol=2e-3), "f32 kernel mismatch vs JAX reference"

    # Default fast path: bf16 MXU operands, f32 accumulate and f32 routing math.
    out = capsule_network_forward(item_eb, mask, w, interest_num=K, routing_times=3)
    out = jax.block_until_ready(out)
    assert out.shape == (B, K, D)
    # Tolerance accounts for bf16 rounding of the bilinear operands feeding back through routing.
    assert jnp.allclose(out, ref, atol=3e-2, rtol=3e-2), "bf16 kernel mismatch vs JAX reference"

    # TODO(synk): relu_layer=False path only; the optional nn.Linear+ReLU readout is omitted
    # (it is disabled by default in the module). stop_grad/detach is a no-op for forward values.
    print("KERNEL_OK")
</pallas_src>

<mosaic_0001>
module attributes {stable_mosaic.version = 11 : i64} {
  func.func @_capsule_kernel(%arg0: i32, %arg1: memref<8x8x32xf32, #tpu.memory_space<vmem>>, %arg2: memref<8x8xf32, #tpu.memory_space<vmem>>, %arg3: memref<8x32x128xf32, #tpu.memory_space<vmem>>, %arg4: memref<128x128xf32, #tpu.memory_space<vmem>>, %arg5: memref<8x128xf32, #tpu.memory_space<vmem>>) attributes {dimension_semantics = [#tpu.dimension_semantics<parallel>], iteration_bounds = array<i64: 1>, scalar_prefetch = 0 : i64, scratch_operands = 0 : i64, tpu.core_type = #tpu.core_type<tc>, window_params = [{transform_indices = @transform_0, window_bounds = array<i64: 8, 8, 32>}, {transform_indices = @transform_1, window_bounds = array<i64: 8, 8>}, {pipeline_mode = #tpu.pipeline_mode<synchronous>, transform_indices = @transform_2, window_bounds = array<i64: 8, 32, 128>}, {pipeline_mode = #tpu.pipeline_mode<synchronous>, transform_indices = @transform_3, window_bounds = array<i64: 128, 128>}, {transform_indices = @transform_4, window_bounds = array<i64: 8, 128>}]} {
    %c0 = arith.constant 0 : index
    %c0_0 = arith.constant 0 : index
    %c0_1 = arith.constant 0 : index
    %0 = vector.load %arg1[%c0, %c0_0, %c0_1] : memref<8x8x32xf32, #tpu.memory_space<vmem>>, vector<8x8x32xf32>
    %c0_2 = arith.constant 0 : index
    %c0_3 = arith.constant 0 : index
    %c0_4 = arith.constant 0 : index
    %1 = vector.load %arg3[%c0_2, %c0_3, %c0_4] : memref<8x32x128xf32, #tpu.memory_space<vmem>>, vector<8x32x128xf32>
    "tpu.trace_start"() <{level = 10 : i32, message = "sbd,sdn->sbn"}> : () -> ()
    %cst = arith.constant dense<0.000000e+00> : vector<8x8x128xf32>
    %2 = tpu.matmul %0, %1, %cst {dimension_numbers = #tpu.dot_dimension_numbers<[2], [1], [1], [2], [0, 0, 0, 1, 1, 2], [0], [0]>} : vector<8x8x32xf32>, vector<8x32x128xf32>, vector<8x8x128xf32> -> vector<8x8x128xf32>
    "tpu.trace_stop"() : () -> ()
    %c0_5 = arith.constant 0 : index
    %c0_6 = arith.constant 0 : index
    %3 = vector.load %arg2[%c0_5, %c0_6] : memref<8x8xf32, #tpu.memory_space<vmem>>, vector<8x8xf32>
    %4 = vector.shape_cast %3 : vector<8x8xf32> to vector<8x8x1xf32>
    %c0_7 = arith.constant 0 : index
    %c0_8 = arith.constant 0 : index
    %5 = vector.load %arg4[%c0_7, %c0_8] : memref<128x128xf32, #tpu.memory_space<vmem>>, vector<128x128xf32>
    %6 = vector.broadcast %4 : vector<8x8x1xf32> to vector<8x8x128xf32>
    %7 = arith.mulf %6, %2 : vector<8x8x128xf32>
    %cst_9 = arith.constant dense<0.000000e+00> : vector<8x128xf32>
    %8 = vector.multi_reduction <add>, %7, %cst_9 [0] : vector<8x8x128xf32> to vector<8x128xf32>
    %cst_10 = arith.constant 1.250000e-01 : f32
    %9 = vector.broadcast %cst_10 : f32 to vector<8x128xf32>
    %10 = arith.mulf %9, %8 : vector<8x128xf32>
    %11 = arith.mulf %10, %10 : vector<8x128xf32>
    %cst_11 = arith.constant dense<0.000000e+00> : vector<8x128xf32>
    %12 = tpu.matmul %11, %5, %cst_11 {dimension_numbers = #tpu.dot_dimension_numbers<[1], [0], [0], [1], [0, 0, 1, 1], [], []>} : vector<8x128xf32>, vector<128x128xf32>, vector<8x128xf32> -> vector<8x128xf32>
    %cst_12 = arith.constant 1.000000e+00 : f32
    %13 = vector.broadcast %cst_12 : f32 to vector<8x128xf32>
    %14 = arith.addf %13, %12 : vector<8x128xf32>
    %15 = arith.divf %12, %14 : vector<8x128xf32>
    %cst_13 = arith.constant 9.99999971E-10 : f32
    %16 = vector.broadcast %cst_13 : f32 to vector<8x128xf32>
    %17 = arith.addf %12, %16 : vector<8x128xf32>
    %18 = math.rsqrt %17 : vector<8x128xf32>
    %19 = arith.mulf %15, %18 : vector<8x128xf32>
    %20 = arith.mulf %19, %10 : vector<8x128xf32>
    %21 = vector.shape_cast %20 : vector<8x128xf32> to vector<1x8x128xf32>
    %22 = vector.broadcast %21 : vector<1x8x128xf32> to vector<8x8x128xf32>
    %23 = arith.mulf %2, %22 : vector<8x8x128xf32>
    %24 = vector.shape_cast %23 : vector<8x8x128xf32> to vector<64x128xf32>
    %cst_14 = arith.constant dense<0.000000e+00> : vector<64x128xf32>
    %25 = tpu.matmul %24, %5, %cst_14 {dimension_numbers = #tpu.dot_dimension_numbers<[1], [0], [0], [1], [0, 0, 1, 1], [], []>} : vector<64x128xf32>, vector<128x128xf32>, vector<64x128xf32> -> vector<64x128xf32>
    %26 = vector.shape_cast %25 : vector<64x128xf32> to vector<8x8x128xf32>
    %cst_15 = arith.constant dense<0xFF800000> : vector<8x128xf32>
    %27 = vector.multi_reduction <maximumf>, %26, %cst_15 [0] : vector<8x8x128xf32> to vector<8x128xf32>
    %28 = vector.shape_cast %27 : vector<8x128xf32> to vector<1x8x128xf32>
    %29 = vector.broadcast %28 : vector<1x8x128xf32> to vector<8x8x128xf32>
    %30 = arith.subf %26, %29 : vector<8x8x128xf32>
    %31 = math.exp %30 : vector<8x8x128xf32>
    %cst_16 = arith.constant dense<0.000000e+00> : vector<8x128xf32>
    %32 = vector.multi_reduction <add>, %31, %cst_16 [0] : vector<8x8x128xf32> to vector<8x128xf32>
    %33 = vector.broadcast %4 : vector<8x8x1xf32> to vector<8x8x128xf32>
    %34 = arith.mulf %33, %31 : vector<8x8x128xf32>
    %35 = arith.mulf %34, %2 : vector<8x8x128xf32>
    %cst_17 = arith.constant dense<0.000000e+00> : vector<8x128xf32>
    %36 = vector.multi_reduction <add>, %35, %cst_17 [0] : vector<8x8x128xf32> to vector<8x128xf32>
    %37 = tpu.reciprocal %32 {approx = true} : vector<8x128xf32> -> vector<8x128xf32>
    %38 = arith.mulf %36, %37 : vector<8x128xf32>
    %39 = arith.mulf %38, %38 : vector<8x128xf32>
    %cst_18 = arith.constant dense<0.000000e+00> : vector<8x128xf32>
    %40 = tpu.matmul %39, %5, %cst_18 {dimension_numbers = #tpu.dot_dimension_numbers<[1], [0], [0], [1], [0, 0, 1, 1], [], []>} : vector<8x128xf32>, vector<128x128xf32>, vector<8x128xf32> -> vector<8x128xf32>
    %cst_19 = arith.constant 1.000000e+00 : f32
    %41 = vector.broadcast %cst_19 : f32 to vector<8x128xf32>
    %42 = arith.addf %41, %40 : vector<8x128xf32>
    %43 = arith.divf %40, %42 : vector<8x128xf32>
    %cst_20 = arith.constant 9.99999971E-10 : f32
    %44 = vector.broadcast %cst_20 : f32 to vector<8x128xf32>
    %45 = arith.addf %40, %44 : vector<8x128xf32>
    %46 = math.rsqrt %45 : vector<8x128xf32>
    %47 = arith.mulf %43, %46 : vector<8x128xf32>
    %48 = arith.mulf %47, %38 : vector<8x128xf32>
    %49 = vector.shape_cast %48 : vector<8x128xf32> to vector<1x8x128xf32>
    %50 = vector.broadcast %49 : vector<1x8x128xf32> to vector<8x8x128xf32>
    %51 = arith.mulf %2, %50 : vector<8x8x128xf32>
    %52 = vector.shape_cast %51 : vector<8x8x128xf32> to vector<64x128xf32>
    %cst_21 = arith.constant dense<0.000000e+00> : vector<64x128xf32>
    %53 = tpu.matmul %52, %5, %cst_21 {dimension_numbers = #tpu.dot_dimension_numbers<[1], [0], [0], [1], [0, 0, 1, 1], [], []>} : vector<64x128xf32>, vector<128x128xf32>, vector<64x128xf32> -> vector<64x128xf32>
    %54 = vector.shape_cast %53 : vector<64x128xf32> to vector<8x8x128xf32>
    %55 = arith.addf %26, %54 : vector<8x8x128xf32>
    %cst_22 = arith.constant dense<0xFF800000> : vector<8x128xf32>
    %56 = vector.multi_reduction <maximumf>, %55, %cst_22 [0] : vector<8x8x128xf32> to vector<8x128xf32>
    %57 = vector.shape_cast %56 : vector<8x128xf32> to vector<1x8x128xf32>
    %58 = vector.broadcast %57 : vector<1x8x128xf32> to vector<8x8x128xf32>
    %59 = arith.subf %55, %58 : vector<8x8x128xf32>
    %60 = math.exp %59 : vector<8x8x128xf32>
    %cst_23 = arith.constant dense<0.000000e+00> : vector<8x128xf32>
    %61 = vector.multi_reduction <add>, %60, %cst_23 [0] : vector<8x8x128xf32> to vector<8x128xf32>
    %62 = vector.broadcast %4 : vector<8x8x1xf32> to vector<8x8x128xf32>
    %63 = arith.mulf %62, %60 : vector<8x8x128xf32>
    %64 = arith.mulf %63, %2 : vector<8x8x128xf32>
    %cst_24 = arith.constant dense<0.000000e+00> : vector<8x128xf32>
    %65 = vector.multi_reduction <add>, %64, %cst_24 [0] : vector<8x8x128xf32> to vector<8x128xf32>
    %66 = tpu.reciprocal %61 {approx = true} : vector<8x128xf32> -> vector<8x128xf32>
    %67 = arith.mulf %65, %66 : vector<8x128xf32>
    %68 = arith.mulf %67, %67 : vector<8x128xf32>
    %cst_25 = arith.constant dense<0.000000e+00> : vector<8x128xf32>
    %69 = tpu.matmul %68, %5, %cst_25 {dimension_numbers = #tpu.dot_dimension_numbers<[1], [0], [0], [1], [0, 0, 1, 1], [], []>} : vector<8x128xf32>, vector<128x128xf32>, vector<8x128xf32> -> vector<8x128xf32>
    %cst_26 = arith.constant 1.000000e+00 : f32
    %70 = vector.broadcast %cst_26 : f32 to vector<8x128xf32>
    %71 = arith.addf %70, %69 : vector<8x128xf32>
    %72 = arith.divf %69, %71 : vector<8x128xf32>
    %cst_27 = arith.constant 9.99999971E-10 : f32
    %73 = vector.broadcast %cst_27 : f32 to vector<8x128xf32>
    %74 = arith.addf %69, %73 : vector<8x128xf32>
    %75 = math.rsqrt %74 : vector<8x128xf32>
    %76 = arith.mulf %72, %75 : vector<8x128xf32>
    %77 = arith.mulf %76, %67 : vector<8x128xf32>
    %c0_28 = arith.constant 0 : index
    %c0_29 = arith.constant 0 : index
    %78 = vector.load %arg5[%c0_28, %c0_29] : memref<8x128xf32, #tpu.memory_space<vmem>>, vector<8x128xf32>
    tpu.vector_store %arg5[%c0_28, %c0_29], %77 {strides = array<i32>} : memref<8x128xf32, #tpu.memory_space<vmem>>, vector<8x128xf32>,
    return
  }
  func.func @transform_0(%arg0: i32) -> (i32, i32, i32) {
    %c0_i32 = arith.constant 0 : i32
    %c0_i32_0 = arith.constant 0 : i32
    %c0_i32_1 = arith.constant 0 : i32
    return %c0_i32, %arg0, %c0_i32_0 : i32, i32, i32
  }
  func.func @transform_1(%arg0: i32) -> (i32, i32) {
    %c0_i32 = arith.constant 0 : i32
    %c0_i32_0 = arith.constant 0 : i32
    return %c0_i32, %arg0 : i32, i32
  }
  func.func @transform_2(%arg0: i32) -> (i32, i32, i32) {
    %c0_i32 = arith.constant 0 : i32
    %c0_i32_0 = arith.constant 0 : i32
    %c0_i32_1 = arith.constant 0 : i32
    %c0_i32_2 = arith.constant 0 : i32
    return %c0_i32, %c0_i32_0, %c0_i32_1 : i32, i32, i32
  }
  func.func @transform_3(%arg0: i32) -> (i32, i32) {
    %c0_i32 = arith.constant 0 : i32
    %c0_i32_0 = arith.constant 0 : i32
    %c0_i32_1 = arith.constant 0 : i32
    return %c0_i32, %c0_i32_0 : i32, i32
  }
  func.func @transform_4(%arg0: i32) -> (i32, i32) {
    %c0_i32 = arith.constant 0 : i32
    %c0_i32_0 = arith.constant 0 : i32
    return %arg0, %c0_i32 : i32, i32
  }
}

</mosaic_0001>

<bundles_post_ra>
// kernel: tpu_custom_call.1
= control target key start
LH: loop header
LB: loop body
LE: loop exit
PB: predicated region body
PF: predicated region fallthrough
CT: control target
= control target key end

     0   :  { %9 = vsyncpa [#allocation3], 0  ;;  %s2601_s0 = inlined_call_operand.hbm [shape: f32[8,8,32], index: 0, kind: input, shape index: {}]   ;;  %s2602_s1 = inlined_call_operand.hbm [shape: f32[8,8], index: 1, kind: input, shape index: {}]   ;;  %s2603_s2 = inlined_call_operand.hbm [shape: f32[8,32,128], index: 2, kind: input, shape index: {}]   ;;  %s2604_s3 = inlined_call_operand.hbm [shape: f32[128,128], index: 3, kind: input, shape index: {}]   ;;  %s2605_s4 = inlined_call_operand.hbm [shape: f32[8,128], index: 4, kind: output, shape index: {}]  }
   0x1   :  { %10 = vsyncpa [#allocation6], 0 }
   0x2   :  { %11 = vsyncpa [#allocation9], 0 }
   0x3   :  { %12 = vsyncpa [#allocation4], 0  ;;  %s2185_s15 = smov [#allocation5]   ;;  %s2186_s17 = smov [#allocation2]  }
   0x4   :  { %s31_s16 = sshll.u32 %s2185_s15, 4  ;;  %s18_s18 = sshll.u32 %s2186_s17, 4  ;;  %s32_s16 = int_to_ptr.vmem [resolvable:$true] %s31_s16  ;;  %s2220_s18 = int_to_ptr.vmem [resolvable:$true] %s18_s18 }
   0x5   :  { %s2067_s21 = scalar_lea.hbm %s2602_s1, 128 }
   0x6   :  { %p2068_p0 = scmp.ne.s32.totalorder %s2602_s1, %s2067_s21  ;;  %p2071_p1 = scmp.lt.u32.totalorder %s2067_s21, %s2602_s1 }
   0x8   :  { %p2073_p2 = pnand %p2071_p1, %p2068_p0 }
   0xa   :  { %2076 = shalt.err (!%p2073_p2)
}
   0xb   :  { %s2077_s26 = scalar_lea.vmem %s32_s16, 128  ;;  %p2082_p4 = scmp.lt.s32.totalorder %s32_s16, %s32_s16 }
   0xc   :  { %p2078_p3 = scmp.ne.s32.totalorder %s32_s16, %s2077_s26  ;;  %p2083_p5 = scmp.lt.s32.totalorder %s2077_s26, %s2077_s26 }
   0xe   :  { %p2084_p6 = por %p2083_p5, %p2082_p4 }
  0x10   :  { %p2085_p7 = pnand %p2084_p6, %p2078_p3 }
  0x12   :  { %2088 = shalt.err (!%p2085_p7)
}
  0x13   :  { %34 = dma.hbm_to_vmem [thread:$0]  %s2602_s1, 128, %s32_s16, [#allocation6]  }
  0x14   :  { %s2089_s5 = scalar_lea.hbm %s2601_s0, 1024 }
  0x15   :  { %p2090_p8 = scmp.ne.s32.totalorder %s2601_s0, %s2089_s5  ;;  %p2093_p9 = scmp.lt.u32.totalorder %s2089_s5, %s2601_s0 }
  0x17   :  { %p2095_p10 = pnand %p2093_p9, %p2090_p8 }
  0x19   :  { %2098 = shalt.err (!%p2095_p10)
}
  0x1a   :  { %s2099_s10 = scalar_lea.vmem %s2220_s18, 1024  ;;  %p2104_p12 = scmp.lt.s32.totalorder %s2220_s18, %s2220_s18 }
  0x1b   :  { %p2100_p11 = scmp.ne.s32.totalorder %s2220_s18, %s2099_s10  ;;  %p2105_p13 = scmp.lt.s32.totalorder %s2099_s10, %s2099_s10 }
  0x1d   :  { %p2106_p0 = por %p2105_p13, %p2104_p12 }
  0x1f   :  { %p2107_p1 = pnand %p2106_p0, %p2100_p11 }
  0x21   :  { %2110 = shalt.err (!%p2107_p1)
}
  0x22   :  { %s2187_s1 = smov 128   ;;  %s2188_s11 = smov 8  }
  0x23   :  { %24 = dma.hbm_to_vmem [thread:$0]  %s2601_s0, 1024, %s2220_s18, [#allocation3], %s2187_s1, %s2187_s1, %s2188_s11  }
  0x24   :  { %s2189_s14 = smov [#allocation7]   ;;  %s2190_s16 = smov [#allocation8]  }
  0x25   :  { %s40_s15 = sshll.u32 %s2189_s14, 4  ;;  %s52_s17 = sshll.u32 %s2190_s16, 4  ;;  %s41_s15 = int_to_ptr.vmem [resolvable:$true] %s40_s15  ;;  %s2254_s17 = int_to_ptr.vmem [resolvable:$true] %s52_s17 }
  0x26   :  { %s2111_s21 = scalar_lea.hbm %s2603_s2, 4096 }
  0x27   :  { %p2112_p2 = scmp.ne.s32.totalorder %s2603_s2, %s2111_s21  ;;  %p2115_p3 = scmp.lt.u32.totalorder %s2111_s21, %s2603_s2 }
  0x29   :  { %p2117_p4 = pnand %p2115_p3, %p2112_p2 }
  0x2b   :  { %2120 = shalt.err (!%p2117_p4)
}
  0x2c   :  { %s2121_s0 = scalar_lea.vmem %s41_s15, 4096  ;;  %p2126_p6 = scmp.lt.s32.totalorder %s41_s15, %s41_s15 }
  0x2d   :  { %p2122_p5 = scmp.ne.s32.totalorder %s41_s15, %s2121_s0  ;;  %p2127_p7 = scmp.lt.s32.totalorder %s2121_s0, %s2121_s0 }
  0x2f   :  { %p2128_p8 = por %p2127_p7, %p2126_p6 }
  0x31   :  { %p2129_p9 = pnand %p2128_p8, %p2122_p5 }
  0x33   :  { %2132 = shalt.err (!%p2129_p9)
}
  0x34   :  { %46 = dma.hbm_to_vmem [thread:$0]  %s2603_s2, 4096, %s41_s15, [#allocation6], %s2187_s1, %s2187_s1, %s2188_s11  }
  0x35   :  { %s2133_s29 = scalar_lea.hbm %s2604_s3, 2048 }
  0x36   :  { %p2134_p10 = scmp.ne.s32.totalorder %s2604_s3, %s2133_s29  ;;  %p2137_p11 = scmp.lt.u32.totalorder %s2133_s29, %s2604_s3 }
  0x38   :  { %p2139_p12 = pnand %p2137_p11, %p2134_p10 }
  0x3a   :  { %2142 = shalt.err (!%p2139_p12)
}
  0x3b   :  { %s2143_s8 = scalar_lea.vmem %s2254_s17, 2048  ;;  %p2148_p0 = scmp.lt.s32.totalorder %s2254_s17, %s2254_s17 }
  0x3c   :  { %p2144_p13 = scmp.ne.s32.totalorder %s2254_s17, %s2143_s8  ;;  %p2149_p1 = scmp.lt.s32.totalorder %s2143_s8, %s2143_s8 }
  0x3e   :  { %p2150_p2 = por %p2149_p1, %p2148_p0 }
  0x40   :  { %p2151_p3 = pnand %p2150_p2, %p2144_p13 }
  0x42   :  { %2154 = shalt.err (!%p2151_p3)
}
  0x43   :  { %58 = dma.hbm_to_vmem [thread:$0]  %s2604_s3, 2048, %s2254_s17, [#allocation9], %s2187_s1, %s2187_s1, %s2188_s11  }
  0x44   :  { %2177 = dma.done.wait [#allocation3], 1024  }
  0x45   :  { %2178 = vsyncadd [#allocation3], 4294966272 }
  0x46   :  { %2179 = dma.done.wait [#allocation6], 4224  }
  0x47   :  { %2180 = vsyncadd [#allocation6], 4294963072 }
  0x48   :  { %2181 = dma.done.wait [#allocation9], 2048  }
  0x49   :  { %2182 = vsyncadd [#allocation9], 4294965248  ;;  %v2191_v0 = vmov 0.0|0.0   ;;  %vm2192_vm0 = vmmov 0   ;;  %v2193_v1 = vmov 0.0   ;;  %v79_v2 = vld [vmem:[#allocation7] sm:$0xff]  ;;  %v697_v9 = vlaneseq }
  0x4a   :  { %1825 = vmatprep.subr.bf16.mxu1 %v2191_v0  ;;  %1552 = vmatprep.mubr.msk.f32.mxu1 %vm2192_vm0, %v2193_v1  ;;  %v80_v3 = vld [vmem:[#allocation7 + $0x8] sm:$0xff]  ;;  %v81_v4 = vld [vmem:[#allocation7 + $0x10] sm:$0xff]  ;;  %v82_v6 = vld [vmem:[#allocation7 + $0x18] sm:$0xff]  ;;  %vm111_vm1 = vcmask 261120   ;;  %s2194_s3 = smov [#allocation10]  }
  0x4b   :  { %1837 = vmatprep.subr.bf16.mxu0 %v2191_v0  ;;  %1574 = vmatprep.mubr.msk.f32.mxu0 %vm2192_vm0, %v2193_v1  ;;  %v1826_v5 = vpack.c.bf16 %v80_v3, %v79_v2  ;;  %v87_v7 = vld [vmem:[#allocation7 + $0x40] sm:$0xff]  ;;  %v88_v8 = vld [vmem:[#allocation7 + $0x48] sm:$0xff]  ;;  %v1829_v10 = vpack.c.bf16 %v82_v6, %v81_v4  ;;  %v89_v12 = vld [vmem:[#allocation7 + $0x50] sm:$0xff]  ;;  %v2299_v19 = vshrl.u32 %v697_v9, 7  ;;  %s1386_s10 = sshll.u32 %s2194_s3, 4  ;;  %s1387_s10 = int_to_ptr.vmem [resolvable:$true] %s1386_s10 }
  0x4c   :  { %v1838_v11 = vpack.c.bf16 %v88_v8, %v87_v7  ;;  %v83_v13 = vld [vmem:[#allocation7 + $0x20] sm:$0xff]  ;;  %v84_v14 = vld [vmem:[#allocation7 + $0x28] sm:$0xff]  ;;  %v90_v15 = vld [vmem:[#allocation7 + $0x58] sm:$0xff]  ;;  %s2155_s1 = scalar_lea.vmem %s1387_s10, 128  ;;  %p2160_p5 = scmp.lt.s32.totalorder %s1387_s10, %s1387_s10 }
  0x4d   :  { %1827 = vmatpush3.bf16.msra.mxu1 %v1826_v5  ;;  %v1841_v16 = vpack.c.bf16 %v90_v15, %v89_v12  ;;  %v95_v17 = vld [vmem:[#allocation7 + $0x80] sm:$0xff]  ;;  %v96_v18 = vld [vmem:[#allocation7 + $0x88] sm:$0xff]  ;;  %v71_v20 = vld [vmem:[#allocation2] sm:$0xff]  ;;  %v1832_v21 = vpack.c.bf16 %v84_v14, %v83_v13  ;;  %v699_v28 = vsub.s32 0, %v2299_v19  ;;  %v713_v29 = vsub.s32 2, %v2299_v19  ;;  %p2156_p4 = scmp.ne.s32.totalorder %s1387_s10, %s2155_s1  ;;  %p2161_p6 = scmp.lt.s32.totalorder %s2155_s1, %s2155_s1 }
  0x4e   :  { %1828 = vmatprep.subr.bf16.mxu1 %v2191_v0  ;;  %1839 = vmatpush3.bf16.msra.mxu0 %v1838_v11  ;;  %v85_v22 = vld [vmem:[#allocation7 + $0x30] sm:$0xff]  ;;  %v86_v23 = vld [vmem:[#allocation7 + $0x38] sm:$0xff]  ;;  %v73_v24 = vld [vmem:[#allocation2 + $0x10] sm:$0xff]  ;;  %v1850_v25 = vpack.c.bf16 %v96_v18, %v95_v17  ;;  %v706_v38 = vsub.s32 1, %v2299_v19  ;;  %v720_v42 = vsub.s32 3, %v2299_v19  ;;  %v727_v50 = vsub.s32 4, %v2299_v19 }
  0x4f   :  { %1840 = vmatprep.subr.bf16.mxu0 %v2191_v0  ;;  %v97_v26 = vld [vmem:[#allocation7 + $0x90] sm:$0xff]  ;;  %v98_v27 = vld [vmem:[#allocation7 + $0x98] sm:$0xff]  ;;  %v1835_v30 = vpack.c.bf16 %v86_v23, %v85_v22  ;;  %v91_v31 = vld [vmem:[#allocation7 + $0x60] sm:$0xff]  ;;  %v734_v56 = vsub.s32 5, %v2299_v19  ;;  %v741_v58 = vsub.s32 6, %v2299_v19  ;;  %v748_v3 = vsub.s32 7, %v2299_v19  ;;  %p2162_p7 = por %p2161_p6, %p2160_p5 }
  0x50   :  { %v92_v32 = vld [vmem:[#allocation7 + $0x68] sm:$0xff]  ;;  %v1853_v33 = vpack.c.bf16 %v98_v27, %v97_v26  ;;  %v2312_v34 = vld [vmem:[#allocation5] sm:$0xff]  ;;  %v103_v35 = vld [vmem:[#allocation7 + $0xc0] sm:$0xff] }
  0x51   :  { %1830 = vmatpush3.bf16.msra.mxu1 %v1829_v10  ;;  %v104_v36 = vld [vmem:[#allocation7 + $0xc8] sm:$0xff]  ;;  %v700_v37 = vrot.slane %v2312_v34, %v699_v28  ;;  %v714_v39 = vrot.slane %v2312_v34, %v713_v29  ;;  %v72_v40 = vld [vmem:[#allocation2 + $0x8] sm:$0xff]  ;;  %v1844_v41 = vpack.c.bf16 %v92_v32, %v91_v31  ;;  %v93_v43 = vld [vmem:[#allocation7 + $0x70] sm:$0xff]  ;;  %v707_v49 = vrot.slane %v2312_v34, %v706_v38  ;;  %p2163_p8 = pnand %p2162_p7, %p2156_p4 }
  0x52   :  { %1831 = vmatprep.subr.bf16.mxu1 %v2191_v0  ;;  %1842 = vmatpush3.bf16.msra.mxu0 %v1841_v16  ;;  %v94_v44 = vld [vmem:[#allocation7 + $0x78] sm:$0xff]  ;;  %v1862_v46 = vpack.c.bf16 %v104_v36, %v103_v35  ;;  %v105_v47 = vld [vmem:[#allocation7 + $0xd0] sm:$0xff]  ;;  %v721_v52 = vrot.slane %v2312_v34, %v720_v42  ;;  %v99_v53 = vld [vmem:[#allocation7 + $0xa0] sm:$0xff]  ;;  %v728_v57 = vrot.slane %v2312_v34, %v727_v50 }
  0x53   :  { %1849 = vmatprep.subr.bf16.mxu0 %v2191_v0  ;;  %702 = vbcast.lane.b32.xlu0 %v700_v37, 256  ;;  %v75_v45 = vld [vmem:[#allocation2 + $0x20] sm:$0xff]  ;;  %v1847_v51 = vpack.c.bf16 %v94_v44, %v93_v43  ;;  %v100_v54 = vld [vmem:[#allocation7 + $0xa8] sm:$0xff]  ;;  %v74_v59 = vld [vmem:[#allocation2 + $0x18] sm:$0xff]  ;;  %v735_v2 = vrot.slane %v2312_v34, %v734_v56  ;;  %v742_v4 = vrot.slane %v2312_v34, %v741_v58 }
  0x54   :  { %1553 = vmatmul.mubr.msk.f32.vlgmr.msra.gmra.mrb[0].mxu1 %vm111_vm1, %v71_v20  ;;  %716 = vbcast.lane.b32.xlu1 %v714_v39, 256  ;;  %v106_v48 = vld [vmem:[#allocation7 + $0xd8] sm:$0xff]  ;;  %v1856_v60 = vpack.c.bf16 %v100_v54, %v99_v53  ;;  %v101_v61 = vld [vmem:[#allocation7 + $0xb0] sm:$0xff]  ;;  %v77_v63 = vld [vmem:[#allocation2 + $0x30] sm:$0xff]  ;;  %v749_v8 = vrot.slane %v2312_v34, %v748_v3 }
  0x55   :  { %1833 = vmatpush3.bf16.msra.mxu1 %v1832_v21  ;;  %1563 = vmatprep.mubr.msk.f32.mxu1 %vm2192_vm0, %v2193_v1  ;;  %v1865_v55 = vpack.c.bf16 %v106_v48, %v105_v47  ;;  %v102_v62 = vld [vmem:[#allocation7 + $0xb8] sm:$0xff]  ;;  %v107_v6 = vld [vmem:[#allocation7 + $0xe0] sm:$0xff]  ;;  %v108_v7 = vld [vmem:[#allocation7 + $0xe8] sm:$0xff] }
  0x56   :  { %1834 = vmatprep.subr.bf16.mxu1 %v2191_v0  ;;  %1575 = vmatmul.mubr.msk.f32.vlgmr.msra.gmra.mrb[0].mxu0 %vm111_vm1, %v73_v24  ;;  %v1859_v5 = vpack.c.bf16 %v102_v62, %v101_v61  ;;  %v76_v9 = vld [vmem:[#allocation2 + $0x28] sm:$0xff]  ;;  %v1868_v10 = vpack.c.bf16 %v108_v7, %v107_v6  ;;  %v109_v11 = vld [vmem:[#allocation7 + $0xf0] sm:$0xff]  ;;  %v110_v12 = vld [vmem:[#allocation7 + $0xf8] sm:$0xff] }
  0x57   :  { %1851 = vmatpush3.bf16.msra.mxu0 %v1850_v25  ;;  %1596 = vmatprep.mubr.msk.f32.mxu0 %vm2192_vm0, %v2193_v1  ;;  %v1871_v13 = vpack.c.bf16 %v110_v12, %v109_v11  ;;  %v78_v14 = vld [vmem:[#allocation2 + $0x38] sm:$0xff]  ;;  %v753_v15 = vld [vmem:[#allocation8] sm:$0xff]  ;;  %v754_v16 = vld [vmem:[#allocation8 + $0x8] sm:$0xff] }
  0x58   :  { %1852 = vmatprep.subr.bf16.mxu0 %v2191_v0  ;;  %709 = vbcast.lane.b32.xlu0 %v707_v49, 256  ;;  %v2354_v17 = vpack.c.bf16 %v754_v16, %v753_v15  ;;  %v755_v18 = vld [vmem:[#allocation8 + $0x10] sm:$0xff]  ;;  %v756_v19 = vld [vmem:[#allocation8 + $0x18] sm:$0xff]  ;;  %v757_v21 = vld [vmem:[#allocation8 + $0x20] sm:$0xff] }
  0x59   :  { %1836 = vmatpush3.bf16.msra.mxu1 %v1835_v30  ;;  %723 = vbcast.lane.b32.xlu1 %v721_v52, 256  ;;  %v2360_v20 = vpack.c.bf16 %v756_v19, %v755_v18  ;;  %v758_v22 = vld [vmem:[#allocation8 + $0x28] sm:$0xff]  ;;  %v759_v24 = vld [vmem:[#allocation8 + $0x30] sm:$0xff]  ;;  %v760_v25 = vld [vmem:[#allocation8 + $0x38] sm:$0xff] }
  0x5a   :  { %1843 = vmatprep.subr.bf16.mxu1 %v2191_v0  ;;  %v2366_v23 = vpack.c.bf16 %v758_v22, %v757_v21  ;;  %v2372_v26 = vpack.c.bf16 %v760_v25, %v759_v24  ;;  %v761_v27 = vld [vmem:[#allocation8 + $0x40] sm:$0xff]  ;;  %v762_v28 = vld [vmem:[#allocation8 + $0x48] sm:$0xff]  ;;  %v763_v30 = vld [vmem:[#allocation8 + $0x50] sm:$0xff] }
  0x5b   :  { %1854 = vmatpush3.bf16.msra.mxu0 %v1853_v33  ;;  %v2378_v29 = vpack.c.bf16 %v762_v28, %v761_v27  ;;  %v764_v31 = vld [vmem:[#allocation8 + $0x58] sm:$0xff]  ;;  %v765_v33 = vld [vmem:[#allocation8 + $0x60] sm:$0xff]  ;;  %v766_v34 = vld [vmem:[#allocation8 + $0x68] sm:$0xff] }
  0x5c   :  { %1564 = vmatmul.mubr.msk.f32.vlgmr.msra.gmra.mrb[2].mxu1 %vm111_vm1, %v72_v40  ;;  %1861 = vmatprep.subr.bf16.mxu0 %v2191_v0  ;;  %v2384_v32 = vpack.c.bf16 %v764_v31, %v763_v30  ;;  %v2390_v35 = vpack.c.bf16 %v766_v34, %v765_v33  ;;  %v767_v36 = vld [vmem:[#allocation8 + $0x70] sm:$0xff]  ;;  %v768_v37 = vld [vmem:[#allocation8 + $0x78] sm:$0xff] }
  0x5d   :  { %1845 = vmatpush3.bf16.msra.mxu1 %v1844_v41  ;;  %1585 = vmatprep.mubr.msk.f32.mxu1 %vm2192_vm0, %v2193_v1  ;;  %v2393_v38 = vpack.c.bf16 %v768_v37, %v767_v36 }
  0x5e   :  { %1846 = vmatprep.subr.bf16.mxu1 %v2191_v0  ;;  %1597 = vmatmul.mubr.msk.f32.vlgmr.msra.gmra.mrb[2].mxu0 %vm111_vm1, %v75_v45 }
  0x5f   :  { %1863 = vmatpush3.bf16.msra.mxu0 %v1862_v46  ;;  %1618 = vmatprep.mubr.msk.f32.mxu0 %vm2192_vm0, %v2193_v1 }
  0x60   :  { %1864 = vmatprep.subr.bf16.mxu0 %v2191_v0  ;;  %730 = vbcast.lane.b32.xlu0 %v728_v57, 256 }
  0x61   :  { %1848 = vmatpush3.bf16.msra.mxu1 %v1847_v51  ;;  %737 = vbcast.lane.b32.xlu1 %v735_v2, 256 }
  0x62   :  { %1855 = vmatprep.subr.bf16.mxu1 %v2191_v0 }
  0x63   :  { %1866 = vmatpush3.bf16.msra.mxu0 %v1865_v55 }
  0x64   :  { %1586 = vmatmul.mubr.msk.f32.vlgmr.msra.gmra.mrb[4].mxu1 %vm111_vm1, %v74_v59  ;;  %1873 = vmatprep.subr.bf16.mxu0 %v2191_v0 }
  0x65   :  { %1857 = vmatpush3.bf16.msra.mxu1 %v1856_v60  ;;  %1607 = vmatprep.mubr.msk.f32.mxu1 %vm2192_vm0, %v2193_v1 }
  0x66   :  { %1858 = vmatprep.subr.bf16.mxu1 %v2191_v0  ;;  %1619 = vmatmul.mubr.msk.f32.vlgmr.msra.gmra.mrb[4].mxu0 %vm111_vm1, %v77_v63 }
  0x67   :  { %744 = vbcast.lane.b32.xlu0 %v742_v4, 256  ;;  %1664 = vmatprep.mubr.msk.f32.mxu0 %vm2192_vm0, %v2193_v1 }
  0x68   :  { %751 = vbcast.lane.b32.xlu1 %v749_v8, 256  ;;  %1875 = vmatpush3.bf16.msra.mxu0 %v2354_v17 }
  0x69   :  { %1860 = vmatpush3.bf16.msra.mxu1 %v1859_v5  ;;  %1876 = vmatprep.subr.bf16.mxu0 %v2191_v0 }
  0x6a   :  { %1867 = vmatprep.subr.bf16.mxu1 %v2191_v0 }
  0x6c   :  { %1608 = vmatmul.mubr.msk.f32.vlgmr.msra.gmra.mrb[6].mxu1 %vm111_vm1, %v76_v9  ;;  %1878 = vmatpush3.bf16.msra.mxu0 %v2360_v20 }
  0x6d   :  { %1869 = vmatpush3.bf16.msra.mxu1 %v1868_v10  ;;  %1629 = vmatprep.mubr.msk.f32.mxu1 %vm2192_vm0, %v2193_v1 }
  0x6e   :  { %1870 = vmatprep.subr.bf16.mxu1 %v2191_v0  ;;  %1879 = vmatprep.subr.bf16.mxu0 %v2191_v0 }
  0x70   :  { %1881 = vmatpush3.bf16.msra.mxu0 %v2366_v23 }
  0x71   :  { %1872 = vmatpush3.bf16.msra.mxu1 %v1871_v13  ;;  %1882 = vmatprep.subr.bf16.mxu0 %v2191_v0 }
  0x72   :  { %1898 = vmatprep.subr.bf16.mxu1 %v2354_v17 }
  0x74   :  { %1630 = vmatmul.mubr.msk.f32.vlgmr.msra.gmra.mrb[8].mxu1 %vm111_vm1, %v78_v14  ;;  %1884 = vmatpush3.bf16.msra.mxu0 %v2372_v26 }
  0x75   :  { %1900 = vmatpush3.bf16.msra.mxu1 %v2354_v17  ;;  %1885 = vmatprep.subr.bf16.mxu0 %v2191_v0 }
  0x76   :  { %1902 = vmatprep.subr.bf16.mxu1 %v2360_v20 }
  0x78   :  { %1887 = vmatpush3.bf16.msra.mxu0 %v2378_v29 }
  0x79   :  { %1904 = vmatpush3.bf16.msra.mxu1 %v2360_v20  ;;  %1888 = vmatprep.subr.bf16.mxu0 %v2191_v0 }
  0x7a   :  { %1906 = vmatprep.subr.bf16.mxu1 %v2366_v23 }
  0x7c   :  { %1890 = vmatpush3.bf16.msra.mxu0 %v2384_v32 }
  0x7d   :  { %1908 = vmatpush3.bf16.msra.mxu1 %v2366_v23  ;;  %1891 = vmatprep.subr.bf16.mxu0 %v2191_v0 }
  0x7e   :  { %1910 = vmatprep.subr.bf16.mxu1 %v2372_v26 }
  0x80   :  { %1893 = vmatpush3.bf16.msra.mxu0 %v2390_v35 }
  0x81   :  { %1912 = vmatpush3.bf16.msra.mxu1 %v2372_v26  ;;  %1894 = vmatprep.subr.bf16.mxu0 %v2191_v0 }
  0x82   :  { %1914 = vmatprep.subr.bf16.mxu1 %v2378_v29 }
  0x84   :  { %1896 = vmatpush3.bf16.msra.mxu0 %v2393_v38 }
  0x85   :  { %1916 = vmatpush3.bf16.msra.mxu1 %v2378_v29  ;;  %1929 = vmatprep.subr.bf16.mxu0 %v2191_v0 }
  0x86   :  { %1918 = vmatprep.subr.bf16.mxu1 %v2384_v32 }
  0x89   :  { %1920 = vmatpush3.bf16.msra.mxu1 %v2384_v32 }
  0x8a   :  { %1922 = vmatprep.subr.bf16.mxu1 %v2390_v35 }
  0x8d   :  { %1924 = vmatpush3.bf16.msra.mxu1 %v2390_v35 }
  0x8e   :  { %1926 = vmatprep.subr.bf16.mxu1 %v2393_v38 }
  0x91   :  { %1928 = vmatpush3.bf16.msra.mxu1 %v2393_v38 }
  0x92   :  { %1954 = vmatprep.subr.bf16.mxu1 %v2354_v17 }
  0xc5   :  { %v2405_v41 = vpop.permute.xlu0 %702 }
  0xc6   :  { %v2411_v45 = vpop.permute.xlu1 %716 }
  0xca   :  { %v2409_v44 = vpop.permute.xlu0 %709 }
  0xcb   :  { %v2423_v55 = vpop.permute.xlu1 %723 }
  0xd2   :  { %v2425_v56 = vpop.permute.xlu0 %730 }
  0xd3   :  { %v2435_v3 = vpop.permute.xlu1 %737 }
  0xd9   :  { %v2437_v4 = vpop.permute.xlu0 %744 }
  0xda   :  { %v2445_v11 = vpop.permute.xlu1 %751 }
 0x127   :  { %v2403_v39 = vpop.f32.mrb[0].mxu1 }
 0x128   :  { %v1554_v40 = vpop.f32.mrb[1].mxu1  ;;  %v769_v47 = vmul.f32 %v2405_v41, %v2403_v39 }
 0x129   :  { %v2407_v42 = vpop.f32.mrb[0].mxu0 }
 0x12a   :  { %v1576_v43 = vpop.f32.mrb[1].mxu0  ;;  %v771_v50 = vmul.f32 %v2411_v45, %v2407_v42 }
 0x12f   :  { %v2413_v46 = vpop.f32.mrb[2].mxu1 }
 0x130   :  { %v770_v48 = vmul.f32 %v2409_v44, %v2413_v46  ;;  %v1565_v49 = vpop.f32.mrb[3].mxu1 }
 0x131   :  { %v2421_v51 = vpop.f32.mrb[2].mxu0 }
 0x132   :  { %v777_v52 = vadd.f32 %v770_v48, %v769_v47  ;;  %v1598_v53 = vpop.f32.mrb[3].mxu0  ;;  %v773_v60 = vmul.f32 %v2425_v56, %v2421_v51 }
 0x134   :  { %v778_v54 = vadd.f32 %v777_v52, %v771_v50 }
 0x137   :  { %v2427_v57 = vpop.f32.mrb[4].mxu1 }
 0x138   :  { %v772_v58 = vmul.f32 %v2423_v55, %v2427_v57  ;;  %v1587_v59 = vpop.f32.mrb[5].mxu1 }
 0x139   :  { %v2433_v61 = vpop.f32.mrb[4].mxu0 }
 0x13a   :  { %v779_v62 = vadd.f32 %v778_v54, %v772_v58  ;;  %v1620_v63 = vpop.f32.mrb[5].mxu0  ;;  %v775_v8 = vmul.f32 %v2437_v4, %v2433_v61 }
 0x13c   :  { %v780_v2 = vadd.f32 %v779_v62, %v773_v60 }
 0x13f   :  { %v2439_v5 = vpop.f32.mrb[6].mxu1 }
 0x140   :  { %v774_v6 = vmul.f32 %v2435_v3, %v2439_v5  ;;  %v1609_v7 = vpop.f32.mrb[7].mxu1 }
 0x142   :  { %v781_v9 = vadd.f32 %v780_v2, %v774_v6 }
 0x144   :  { %v782_v10 = vadd.f32 %v781_v9, %v775_v8 }
 0x147   :  { %v2447_v12 = vpop.f32.mrb[8].mxu1 }
 0x148   :  { %v776_v13 = vmul.f32 %v2445_v11, %v2447_v12  ;;  %v1631_v14 = vpop.f32.mrb[9].mxu1 }
 0x14a   :  { %v783_v15 = vadd.f32 %v782_v10, %v776_v13 }
 0x14c   :  { %v784_v16 = vmul.f32 0.125, %v783_v15 }
 0x14e   :  { %v785_v18 = vmul.f32 %v784_v16, %v784_v16 }
 0x150   :  { %1665 = vmatmul.mubr.f32.vlgmr.msra.gmra.mrb[6].mxu0 %v785_v18 }
 0x151   :  { %1931 = vmatpush3.bf16.msra.mxu0 %v2354_v17  ;;  %1743 = vmatprep.mubr.msk.f32.mxu0 %vm2192_vm0, %v2193_v1 }
 0x152   :  { %1932 = vmatprep.subr.bf16.mxu0 %v2191_v0 }
 0x155   :  { %1934 = vmatpush3.bf16.msra.mxu0 %v2360_v20 }
 0x156   :  { %1935 = vmatprep.subr.bf16.mxu0 %v2191_v0 }
 0x159   :  { %1937 = vmatpush3.bf16.msra.mxu0 %v2366_v23 }
 0x15a   :  { %1938 = vmatprep.subr.bf16.mxu0 %v2191_v0 }
 0x15d   :  { %1940 = vmatpush3.bf16.msra.mxu0 %v2372_v26 }
 0x15e   :  { %1941 = vmatprep.subr.bf16.mxu0 %v2191_v0 }
 0x161   :  { %1943 = vmatpush3.bf16.msra.mxu0 %v2378_v29 }
 0x162   :  { %1944 = vmatprep.subr.bf16.mxu0 %v2191_v0 }
 0x165   :  { %1946 = vmatpush3.bf16.msra.mxu0 %v2384_v32 }
 0x166   :  { %1947 = vmatprep.subr.bf16.mxu0 %v2191_v0 }
 0x169   :  { %1949 = vmatpush3.bf16.msra.mxu0 %v2390_v35 }
 0x16a   :  { %1950 = vmatprep.subr.bf16.mxu0 %v2191_v0 }
 0x16d   :  { %1952 = vmatpush3.bf16.msra.mxu0 %v2393_v38 }
 0x16e   :  { %1985 = vmatprep.subr.bf16.mxu0 %v2191_v0 }
 0x223   :  { %v852_v19 = vpop.f32.mrb[6].mxu0 }
 0x224   :  { %v856_v21 = vadd.f32 1.0, %v852_v19  ;;  %v859_v22 = vadd.f32 1e-09, %v852_v19  ;;  %v1666_v24 = vpop.f32.mrb[7].mxu0 }
 0x226   :  { %2019 = vrcp.f32 %v856_v21 }
 0x227   :  { %2021 = vrsqrt.f32 %v859_v22 }
 0x230   :  { %v2020_v25 = vpop.eup %2019 }
 0x231   :  { %v858_v27 = vmul.f32 %v2020_v25, %v852_v19  ;;  %v2022_v28 = vpop.eup %2021 }
 0x233   :  { %v861_v30 = vmul.f32 %v2022_v28, %v858_v27 }
 0x235   :  { %v862_v31 = vmul.f32 %v861_v30, %v784_v16 }
 0x237   :  { %v863_v33 = vmul.f32 %v862_v31, %v2403_v39  ;;  %v864_v34 = vmul.f32 %v862_v31, %v2413_v46  ;;  %v865_v36 = vmul.f32 %v862_v31, %v2407_v42  ;;  %v866_v37 = vmul.f32 %v862_v31, %v2427_v57 }
 0x238   :  { %v867_v40 = vmul.f32 %v862_v31, %v2421_v51  ;;  %v868_v43 = vmul.f32 %v862_v31, %v2439_v5  ;;  %v869_v47 = vmul.f32 %v862_v31, %v2433_v61  ;;  %v870_v48 = vmul.f32 %v862_v31, %v2447_v12 }
 0x239   :  { %1699 = vmatprep.mubr.f32.mxu1 %v863_v33 }
 0x23a   :  { %1700 = vmatmul.mubr.f32.vlgmr.msra.gmra.mrb[10].mxu1 %v864_v34 }
 0x23b   :  { %1702 = vmatprep.mubr.f32.mxu1 %v865_v36  ;;  %1956 = vmatpush3.bf16.msra.mxu1 %v2354_v17 }
 0x23c   :  { %1958 = vmatprep.subr.bf16.mxu1 %v2360_v20 }
 0x23e   :  { %1703 = vmatmul.mubr.f32.gmra.mrb[12].mxu1 %v866_v37 }
 0x23f   :  { %1705 = vmatprep.mubr.f32.mxu1 %v867_v40  ;;  %1960 = vmatpush3.bf16.msra.mxu1 %v2360_v20 }
 0x240   :  { %1962 = vmatprep.subr.bf16.mxu1 %v2366_v23 }
 0x242   :  { %1706 = vmatmul.mubr.f32.gmra.mrb[14].mxu1 %v868_v43 }
 0x243   :  { %1708 = vmatprep.mubr.f32.mxu1 %v869_v47  ;;  %1964 = vmatpush3.bf16.msra.mxu1 %v2366_v23 }
 0x244   :  { %1966 = vmatprep.subr.bf16.mxu1 %v2372_v26 }
 0x246   :  { %1709 = vmatmul.mubr.f32.gmra.mrb[16].mxu1 %v870_v48 }
 0x247   :  { %1968 = vmatpush3.bf16.msra.mxu1 %v2372_v26 }
 0x248   :  { %1970 = vmatprep.subr.bf16.mxu1 %v2378_v29 }
 0x24b   :  { %1972 = vmatpush3.bf16.msra.mxu1 %v2378_v29 }
 0x24c   :  { %1974 = vmatprep.subr.bf16.mxu1 %v2384_v32 }
 0x24f   :  { %1976 = vmatpush3.bf16.msra.mxu1 %v2384_v32 }
 0x250   :  { %1978 = vmatprep.subr.bf16.mxu1 %v2390_v35 }
 0x253   :  { %1980 = vmatpush3.bf16.msra.mxu1 %v2390_v35 }
 0x254   :  { %1982 = vmatprep.subr.bf16.mxu1 %v2393_v38 }
 0x257   :  { %1984 = vmatpush3.bf16.msra.mxu1 %v2393_v38 }
 0x30d   :  { %v2492_v49 = vpop.f32.mrb[10].mxu1 }
 0x30e   :  { %v2494_v50 = vpop.f32.mrb[11].mxu1 }
 0x311   :  { %v2496_v52 = vpop.f32.mrb[12].mxu1 }
 0x312   :  { %v2498_v53 = vpop.f32.mrb[13].mxu1 }
 0x315   :  { %v2500_v54 = vpop.f32.mrb[14].mxu1 }
 0x316   :  { %v977_v58 = vmax.f32 %v2492_v49, %v2500_v54  ;;  %v2504_v59 = vpop.f32.mrb[15].mxu1 }
 0x317   :  { %v976_v60 = vmax.f32 %v2494_v50, %v2504_v59 }
 0x319   :  { %v980_v62 = vmax.f32 %v976_v60, %v977_v58  ;;  %v2508_v63 = vpop.f32.mrb[16].mxu1 }
 0x31a   :  { %v979_v2 = vmax.f32 %v2496_v52, %v2508_v63  ;;  %v2512_v6 = vpop.f32.mrb[17].mxu1 }
 0x31b   :  { %v978_v7 = vmax.f32 %v2498_v53, %v2512_v6 }
 0x31d   :  { %v981_v8 = vmax.f32 %v978_v7, %v979_v2 }
 0x31f   :  { %v982_v9 = vmax.f32 %v980_v62, %v981_v8 }
 0x321   :  { %v983_v10 = vsub.f32 %v2494_v50, %v982_v9  ;;  %v984_v13 = vsub.f32 %v2492_v49, %v982_v9  ;;  %v985_v14 = vsub.f32 %v2498_v53, %v982_v9  ;;  %v986_v15 = vsub.f32 %v2496_v52, %v982_v9 }
 0x322   :  { %v987_v16 = vsub.f32 %v2504_v59, %v982_v9  ;;  %v988_v18 = vsub.f32 %v2500_v54, %v982_v9  ;;  %v989_v19 = vsub.f32 %v2512_v6, %v982_v9  ;;  %v990_v21 = vsub.f32 %v2508_v63, %v982_v9 }
 0x323   :  { %v991_v22 = vmul.f32 1.442695, %v983_v10  ;;  %v993_v24 = vmul.f32 1.442695, %v984_v13  ;;  %v995_v25 = vmul.f32 1.442695, %v985_v14 }
 0x324   :  { %v997_v27 = vmul.f32 1.442695, %v986_v15  ;;  %v999_v28 = vmul.f32 1.442695, %v987_v16  ;;  %v1001_v30 = vmul.f32 1.442695, %v988_v18 }
 0x325   :  { %2023 = vpow2.f32 %v991_v22  ;;  %v1003_v31 = vmul.f32 1.442695, %v989_v19  ;;  %v1005_v33 = vmul.f32 1.442695, %v990_v21 }
 0x326   :  { %2025 = vpow2.f32 %v993_v24 }
 0x327   :  { %2027 = vpow2.f32 %v995_v25 }
 0x328   :  { %2029 = vpow2.f32 %v997_v27 }
 0x329   :  { %2031 = vpow2.f32 %v999_v28 }
 0x32a   :  { %2033 = vpow2.f32 %v1001_v30 }
 0x32b   :  { %2035 = vpow2.f32 %v1003_v31 }
 0x32c   :  { %2037 = vpow2.f32 %v1005_v33 }
 0x32f   :  { %v2024_v34 = vpop.eup %2023 }
 0x330   :  { %v2026_v36 = vpop.eup %2025  ;;  %v1014_v37 = vmul.f32 %v2024_v34, %v2405_v41 }
 0x331   :  { %v2028_v40 = vpop.eup %2027  ;;  %v1007_v43 = vadd.f32 %v2026_v36, %v2024_v34  ;;  %v1015_v47 = vmul.f32 %v2026_v36, %v2409_v44 }
 0x332   :  { %v2030_v48 = vpop.eup %2029  ;;  %v1016_v58 = vmul.f32 %v2028_v40, %v2411_v45  ;;  %v1022_v60 = vmul.f32 %v1014_v37, %v2403_v39 }
 0x333   :  { %v2032_v62 = vpop.eup %2031  ;;  %v1008_v2 = vadd.f32 %v2028_v40, %v1007_v43  ;;  %v1017_v7 = vmul.f32 %v2030_v48, %v2423_v55  ;;  %v1023_v8 = vmul.f32 %v1015_v47, %v2413_v46 }
 0x334   :  { %v2034_v9 = vpop.eup %2033  ;;  %v1018_v10 = vmul.f32 %v2032_v62, %v2425_v56  ;;  %v1024_v13 = vmul.f32 %v1016_v58, %v2407_v42 }
 0x335   :  { %v2036_v14 = vpop.eup %2035  ;;  %v1009_v15 = vadd.f32 %v2030_v48, %v1008_v2  ;;  %v1019_v16 = vmul.f32 %v2034_v9, %v2435_v3  ;;  %v1025_v18 = vmul.f32 %v1017_v7, %v2427_v57  ;;  %v1030_v19 = vadd.f32 %v1023_v8, %v1022_v60 }
 0x336   :  { %v2038_v21 = vpop.eup %2037  ;;  %v1020_v22 = vmul.f32 %v2036_v14, %v2437_v4  ;;  %v1026_v24 = vmul.f32 %v1018_v10, %v2421_v51 }
 0x337   :  { %v1010_v25 = vadd.f32 %v2032_v62, %v1009_v15  ;;  %v1021_v27 = vmul.f32 %v2038_v21, %v2445_v11  ;;  %v1027_v28 = vmul.f32 %v1019_v16, %v2439_v5  ;;  %v1031_v30 = vadd.f32 %v1030_v19, %v1024_v13 }
 0x338   :  { %v1028_v31 = vmul.f32 %v1020_v22, %v2433_v61 }
 0x339   :  { %v1011_v33 = vadd.f32 %v2034_v9, %v1010_v25  ;;  %v1029_v34 = vmul.f32 %v1021_v27, %v2447_v12  ;;  %v1032_v36 = vadd.f32 %v1031_v30, %v1025_v18 }
 0x33b   :  { %v1012_v37 = vadd.f32 %v2036_v14, %v1011_v33  ;;  %v1033_v40 = vadd.f32 %v1032_v36, %v1026_v24 }
 0x33d   :  { %v1013_v43 = vadd.f32 %v2038_v21, %v1012_v37  ;;  %v1034_v47 = vadd.f32 %v1033_v40, %v1027_v28 }
 0x33f   :  { %2039 = vrcp.f32 %v1013_v43  ;;  %v1035_v48 = vadd.f32 %v1034_v47, %v1028_v31 }
 0x341   :  { %v1036_v58 = vadd.f32 %v1035_v48, %v1029_v34 }
 0x349   :  { %v2040_v60 = vpop.eup %2039 }
 0x34a   :  { %v1038_v62 = vmul.f32 %v2040_v60, %v1036_v58 }
 0x34c   :  { %v1039_v2 = vmul.f32 %v1038_v62, %v1038_v62 }
 0x34e   :  { %1744 = vmatmul.mubr.f32.vlgmr.msra.gmra.mrb[8].mxu0 %v1039_v2 }
 0x34f   :  { %1987 = vmatpush3.bf16.msra.mxu0 %v2354_v17  ;;  %1822 = vmatprep.mubr.msk.f32.mxu0 %vm2192_vm0, %v2193_v1 }
 0x350   :  { %1988 = vmatprep.subr.bf16.mxu0 %v2191_v0 }
 0x353   :  { %1990 = vmatpush3.bf16.msra.mxu0 %v2360_v20 }
 0x354   :  { %1991 = vmatprep.subr.bf16.mxu0 %v2191_v0 }
 0x357   :  { %1993 = vmatpush3.bf16.msra.mxu0 %v2366_v23 }
 0x358   :  { %1994 = vmatprep.subr.bf16.mxu0 %v2191_v0 }
 0x35b   :  { %1996 = vmatpush3.bf16.msra.mxu0 %v2372_v26 }
 0x35c   :  { %1997 = vmatprep.subr.bf16.mxu0 %v2191_v0 }
 0x35f   :  { %1999 = vmatpush3.bf16.msra.mxu0 %v2378_v29 }
 0x360   :  { %2000 = vmatprep.subr.bf16.mxu0 %v2191_v0 }
 0x363   :  { %2002 = vmatpush3.bf16.msra.mxu0 %v2384_v32 }
 0x364   :  { %2003 = vmatprep.subr.bf16.mxu0 %v2191_v0 }
 0x367   :  { %2005 = vmatpush3.bf16.msra.mxu0 %v2390_v35 }
 0x368   :  { %2006 = vmatprep.subr.bf16.mxu0 %v2191_v0 }
 0x36b   :  { %2008 = vmatpush3.bf16.msra.mxu0 %v2393_v38 }
 0x421   :  { %v1106_v1 = vpop.f32.mrb[8].mxu0 }
 0x422   :  { %v1110_v17 = vadd.f32 1.0, %v1106_v1  ;;  %v1113_v20 = vadd.f32 1e-09, %v1106_v1  ;;  %v1745_v23 = vpop.f32.mrb[9].mxu0 }
 0x424   :  { %2041 = vrcp.f32 %v1110_v17 }
 0x425   :  { %2043 = vrsqrt.f32 %v1113_v20 }
 0x42e   :  { %v2042_v26 = vpop.eup %2041 }
 0x42f   :  { %v1112_v29 = vmul.f32 %v2042_v26, %v1106_v1  ;;  %v2044_v7 = vpop.eup %2043 }
 0x431   :  { %v1115_v8 = vmul.f32 %v2044_v7, %v1112_v29 }
 0x433   :  { %v1116_v9 = vmul.f32 %v1115_v8, %v1038_v62 }
 0x435   :  { %v1117_v32 = vmul.f32 %v1116_v9, %v2403_v39  ;;  %v1118_v10 = vmul.f32 %v1116_v9, %v2413_v46  ;;  %v1119_v35 = vmul.f32 %v1116_v9, %v2407_v42  ;;  %v1120_v0 = vmul.f32 %v1116_v9, %v2427_v57 }
 0x436   :  { %v1121_v38 = vmul.f32 %v1116_v9, %v2421_v51  ;;  %v1122_v13 = vmul.f32 %v1116_v9, %v2439_v5  ;;  %v1123_v14 = vmul.f32 %v1116_v9, %v2433_v61  ;;  %v1124_v15 = vmul.f32 %v1116_v9, %v2447_v12 }
 0x437   :  { %1778 = vmatprep.mubr.f32.mxu1 %v1117_v32 }
 0x438   :  { %1779 = vmatmul.mubr.f32.vlgmr.msra.gmra.mrb[18].mxu1 %v1118_v10 }
 0x439   :  { %1781 = vmatprep.mubr.f32.mxu1 %v1119_v35 }
 0x43c   :  { %1782 = vmatmul.mubr.f32.gmra.mrb[20].mxu1 %v1120_v0 }
 0x43d   :  { %1784 = vmatprep.mubr.f32.mxu1 %v1121_v38 }
 0x440   :  { %1785 = vmatmul.mubr.f32.gmra.mrb[22].mxu1 %v1122_v13 }
 0x441   :  { %1787 = vmatprep.mubr.f32.mxu1 %v1123_v14 }
 0x444   :  { %1788 = vmatmul.mubr.f32.gmra.mrb[24].mxu1 %v1124_v15 }
 0x50b   :  { %v1780_v16 = vpop.f32.mrb[18].mxu1 }
 0x50c   :  { %v1231_v18 = vadd.f32 %v1780_v16, %v2492_v49  ;;  %v1191_v19 = vpop.f32.mrb[19].mxu1 }
 0x50d   :  { %v1230_v21 = vadd.f32 %v1191_v19, %v2494_v50 }
 0x50f   :  { %v1783_v22 = vpop.f32.mrb[20].mxu1 }
 0x510   :  { %v1233_v24 = vadd.f32 %v1783_v22, %v2496_v52  ;;  %v1201_v25 = vpop.f32.mrb[21].mxu1 }
 0x511   :  { %v1232_v27 = vadd.f32 %v1201_v25, %v2498_v53 }
 0x513   :  { %v1786_v28 = vpop.f32.mrb[22].mxu1 }
 0x514   :  { %v1235_v30 = vadd.f32 %v1786_v28, %v2500_v54  ;;  %v1211_v31 = vpop.f32.mrb[23].mxu1 }
 0x515   :  { %v1234_v33 = vadd.f32 %v1211_v31, %v2504_v59 }
 0x516   :  { %v1239_v34 = vmax.f32 %v1231_v18, %v1235_v30 }
 0x517   :  { %v1238_v36 = vmax.f32 %v1230_v21, %v1234_v33  ;;  %v1789_v37 = vpop.f32.mrb[24].mxu1 }
 0x518   :  { %v1237_v49 = vadd.f32 %v1789_v37, %v2508_v63  ;;  %v1221_v40 = vpop.f32.mrb[25].mxu1 }
 0x519   :  { %v1242_v43 = vmax.f32 %v1238_v36, %v1239_v34  ;;  %v1236_v50 = vadd.f32 %v1221_v40, %v2512_v6 }
 0x51a   :  { %v1241_v47 = vmax.f32 %v1233_v24, %v1237_v49 }
 0x51b   :  { %v1240_v52 = vmax.f32 %v1232_v27, %v1236_v50 }
 0x51d   :  { %v1243_v48 = vmax.f32 %v1240_v52, %v1241_v47 }
 0x51f   :  { %v1244_v58 = vmax.f32 %v1242_v43, %v1243_v48 }
 0x521   :  { %v1245_v53 = vsub.f32 %v1230_v21, %v1244_v58  ;;  %v1246_v60 = vsub.f32 %v1231_v18, %v1244_v58  ;;  %v1247_v62 = vsub.f32 %v1232_v27, %v1244_v58  ;;  %v1248_v54 = vsub.f32 %v1233_v24, %v1244_v58 }
 0x522   :  { %v1249_v2 = vsub.f32 %v1234_v33, %v1244_v58  ;;  %v1250_v1 = vsub.f32 %v1235_v30, %v1244_v58  ;;  %v1251_v59 = vsub.f32 %v1236_v50, %v1244_v58  ;;  %v1252_v17 = vsub.f32 %v1237_v49, %v1244_v58 }
 0x523   :  { %v1253_v20 = vmul.f32 1.442695, %v1245_v53  ;;  %v1255_v23 = vmul.f32 1.442695, %v1246_v60  ;;  %v1257_v26 = vmul.f32 1.442695, %v1247_v62 }
 0x524   :  { %v1259_v63 = vmul.f32 1.442695, %v1248_v54  ;;  %v1261_v29 = vmul.f32 1.442695, %v1249_v2  ;;  %v1263_v6 = vmul.f32 1.442695, %v1250_v1 }
 0x525   :  { %2045 = vpow2.f32 %v1253_v20  ;;  %v1265_v7 = vmul.f32 1.442695, %v1251_v59  ;;  %v1267_v8 = vmul.f32 1.442695, %v1252_v17 }
 0x526   :  { %2047 = vpow2.f32 %v1255_v23 }
 0x527   :  { %2049 = vpow2.f32 %v1257_v26 }
 0x528   :  { %2051 = vpow2.f32 %v1259_v63 }
 0x529   :  { %2053 = vpow2.f32 %v1261_v29 }
 0x52a   :  { %2055 = vpow2.f32 %v1263_v6 }
 0x52b   :  { %2057 = vpow2.f32 %v1265_v7 }
 0x52c   :  { %2059 = vpow2.f32 %v1267_v8 }
 0x52f   :  { %v2046_v9 = vpop.eup %2045 }
 0x530   :  { %v2048_v32 = vpop.eup %2047  ;;  %v1276_v10 = vmul.f32 %v2046_v9, %v2405_v41 }
 0x531   :  { %v2050_v35 = vpop.eup %2049  ;;  %v1269_v0 = vadd.f32 %v2048_v32, %v2046_v9  ;;  %v1277_v38 = vmul.f32 %v2048_v32, %v2409_v44 }
 0x532   :  { %v2052_v13 = vpop.eup %2051  ;;  %v1278_v14 = vmul.f32 %v2050_v35, %v2411_v45  ;;  %v1284_v15 = vmul.f32 %v1276_v10, %v2403_v39 }
 0x533   :  { %v2054_v16 = vpop.eup %2053  ;;  %v1270_v18 = vadd.f32 %v2050_v35, %v1269_v0  ;;  %v1279_v19 = vmul.f32 %v2052_v13, %v2423_v55  ;;  %v1285_v21 = vmul.f32 %v1277_v38, %v2413_v46 }
 0x534   :  { %v2056_v22 = vpop.eup %2055  ;;  %v1280_v24 = vmul.f32 %v2054_v16, %v2425_v56  ;;  %v1286_v41 = vmul.f32 %v1278_v14, %v2407_v42 }
 0x535   :  { %v2058_v25 = vpop.eup %2057  ;;  %v1271_v27 = vadd.f32 %v2052_v13, %v1270_v18  ;;  %v1281_v44 = vmul.f32 %v2056_v22, %v2435_v3  ;;  %v1287_v28 = vmul.f32 %v1279_v19, %v2427_v57  ;;  %v1292_v45 = vadd.f32 %v1285_v21, %v1284_v15 }
 0x536   :  { %v2060_v30 = vpop.eup %2059  ;;  %v1282_v39 = vmul.f32 %v2058_v25, %v2437_v4  ;;  %v1288_v31 = vmul.f32 %v1280_v24, %v2421_v51 }
 0x537   :  { %v1272_v55 = vadd.f32 %v2054_v16, %v1271_v27  ;;  %v1283_v46 = vmul.f32 %v2060_v30, %v2445_v11  ;;  %v1289_v33 = vmul.f32 %v1281_v44, %v2439_v5  ;;  %v1293_v56 = vadd.f32 %v1292_v45, %v1286_v41 }
 0x538   :  { %v1290_v42 = vmul.f32 %v1282_v39, %v2433_v61 }
 0x539   :  { %v1273_v34 = vadd.f32 %v2056_v22, %v1272_v55  ;;  %v1291_v36 = vmul.f32 %v1283_v46, %v2447_v12  ;;  %v1294_v3 = vadd.f32 %v1293_v56, %v1287_v28 }
 0x53b   :  { %v1274_v37 = vadd.f32 %v2058_v25, %v1273_v34  ;;  %v1295_v57 = vadd.f32 %v1294_v3, %v1288_v31 }
 0x53d   :  { %v1275_v49 = vadd.f32 %v2060_v30, %v1274_v37  ;;  %v1296_v40 = vadd.f32 %v1295_v57, %v1289_v33 }
 0x53f   :  { %2061 = vrcp.f32 %v1275_v49  ;;  %v1297_v4 = vadd.f32 %v1296_v40, %v1290_v42 }
 0x541   :  { %v1298_v43 = vadd.f32 %v1297_v4, %v1291_v36 }
 0x549   :  { %v2062_v51 = vpop.eup %2061 }
 0x54a   :  { %v1300_v50 = vmul.f32 %v2062_v51, %v1298_v43 }
 0x54c   :  { %v1301_v47 = vmul.f32 %v1300_v50, %v1300_v50 }
 0x54e   :  { %1823 = vmatmul.mubr.f32.vlgmr.msra.gmra.mrb[10].mxu0 %v1301_v47 }
 0x621   :  { %v1368_v11 = vpop.f32.mrb[10].mxu0 }
 0x622   :  { %v1372_v5 = vadd.f32 1.0, %v1368_v11  ;;  %v1375_v52 = vadd.f32 1e-09, %v1368_v11  ;;  %v1824_v48 = vpop.f32.mrb[11].mxu0 }
 0x624   :  { %2063 = vrcp.f32 %v1372_v5 }
 0x625   :  { %2065 = vrsqrt.f32 %v1375_v52 }
 0x62e   :  { %v2064_v61 = vpop.eup %2063 }
 0x62f   :  { %v1374_v12 = vmul.f32 %v2064_v61, %v1368_v11  ;;  %v2066_v58 = vpop.eup %2065 }
 0x631   :  { %v1377_v53 = vmul.f32 %v2066_v58, %v1374_v12 }
 0x633   :  { %v1378_v60 = vmul.f32 %v1377_v53, %v1300_v50 }
 0x635   :  { %1379 = vst [vmem:[#allocation10] sm:$0xff] %v1378_v60 }
 0x636   :  { %2166 = shalt.err (!%p2163_p8)
}
 0x637   :  { %s2167_s13 = scalar_lea.hbm %s2605_s4, 128 }
 0x638   :  { %p2168_p9 = scmp.ne.s32.totalorder %s2605_s4, %s2167_s13  ;;  %p2171_p10 = scmp.lt.u32.totalorder %s2167_s13, %s2605_s4 }
 0x63a   :  { %p2173_p11 = pnand %p2171_p10, %p2168_p9 }
 0x63c   :  { %2176 = shalt.err (!%p2173_p11)
}
 0x63d   :  { %1389 = dma.vmem_to_hbm [thread:$0]  %s1387_s10, 128, %s2605_s4, [#allocation4]  }
 0x63e   :  { %2183 = dma.done.wait [#allocation4], 128  }
 0x63f   :  { %2184 = vsyncadd [#allocation4], 4294967168 }
 0x640   :  { %1393 = vsyncpa [#allocation3], 1 }
 0x641   :  { %1394 = vsyncpa [#allocation6], 1 }
 0x642   :  { %1395 = vsyncpa [#allocation9], 1 }
 0x643   :  { %1396 = vsyncpa [#allocation4], 1 }

</bundles_post_ra>
